<compile_context>
chip_gen: v7x
topology: tpu7x:2x2x1
jax: 0.10.0
libtpu: 0.0.40
codegen_flags: <defaults>
</compile_context>

<pallas_src>
import jax
import jax.numpy as jnp
from jax.experimental import pallas as pl
from jax.experimental.pallas import tpu as pltpu

EMBED_DIM = 32
DEC_EMBED_DIM = 32
BIN_NUM = 10
BIN_ALPHA = 1.0
MAX_SEQ_LEN = 64
MASK_TOKEN_ID = 102.0
PAD_TOKEN_ID = 103.0
LN_EPS = 1e-5

TM_MAX = 1024  # token-tile cap (multiple of 8; ~0.5 MiB double-buffered VMEM per stream)

# Matmul-input dtype.  jnp.float32 keeps tight agreement with the f32 reference.
# On v6e/v7x set to jnp.bfloat16 for ~3x fewer MXU passes + halved weight DMA;
# the value/sentinel column always stays f32 so ==102/103 compares stay exact.
MATMUL_DTYPE = jnp.float32


def _round_up(x, m):
    return ((x + m - 1) // m) * m


def _pick_tile(T):
    """Return (TM, T_padded) with T_padded % TM == 0 and TM as large as practical."""
    Tp = _round_up(T, 8)
    if Tp <= TM_MAX:
        return Tp, Tp            # single tile, block == full array extent
    Tp = _round_up(T, TM_MAX)
    return TM_MAX, Tp


def _pad_rows(x, Tp):
    T = x.shape[0]
    if Tp == T:
        return x
    return jnp.pad(x, ((0, Tp - T),) + ((0, 0),) * (x.ndim - 1))


def _mm(a, b):
    return jnp.dot(a.astype(MATMUL_DTYPE), b.astype(MATMUL_DTYPE),
                   preferred_element_type=jnp.float32)


# ---------------- Kernel A: AutoDiscretization embedding ----------------
def _autobin_core(v, w1t, b1, w2t, b2, emb, memb, pemb):
    # Linear(1, bin_num) applied to a scalar == broadcast scale + shift (VPU)
    h = v * w1t + b1                                  # (TM, BIN_NUM)
    h = jnp.where(h >= 0.0, h, 0.1 * h)               # LeakyReLU(0.1)
    h2 = _mm(h, w2t) + b2                             # mlp2 cross-layer
    h = BIN_ALPHA * h + h2
    # softmax over bins; divide moved to the EUP via approximate reciprocal
    mx = jnp.max(h, axis=-1, keepdims=True)
    e = jnp.exp(h - mx)
    w = e * pl.reciprocal(jnp.sum(e, axis=-1, keepdims=True), approx=True)
    out = _mm(w, emb)                                 # (TM, D) soft bin embedding
    out = jnp.where(v == MASK_TOKEN_ID, memb, out)    # mask-token rows
    out = jnp.where(v == PAD_TOKEN_ID, pemb, out)     # pad-token rows
    return out


def _autobin_kernel_bias(v_ref, bias_ref, w1t_ref, b1_ref, w2t_ref, b2_ref,
                         emb_ref, memb_ref, pemb_ref, out_ref):
    out_ref[...] = _autobin_core(v_ref[...], w1t_ref[...], b1_ref[...],
                                 w2t_ref[...], b2_ref[...], emb_ref[...],
                                 memb_ref[...], pemb_ref[...]) + bias_ref[...]


def _autobin_kernel_nobias(v_ref, w1t_ref, b1_ref, w2t_ref, b2_ref,
                           emb_ref, memb_ref, pemb_ref, out_ref):
    out_ref[...] = _autobin_core(v_ref[...], w1t_ref[...], b1_ref[...],
                                 w2t_ref[...], b2_ref[...], emb_ref[...],
                                 memb_ref[...], pemb_ref[...])


def autobin_embed(params, values, add_bias=None):
    """values: (T, 1) f32; add_bias: optional (T, D) f32 added in-kernel -> (T, D) f32."""
    T = values.shape[0]
    D = EMBED_DIM
    TM, Tp = _pick_tile(T)
    v = _pad_rows(values, Tp)
    full = lambda i: (0, 0)
    row = lambda i: (i, 0)
    weight_args = (params["w1t"], params["b1"], params["w2t"], params["b2"],
                   params["emb"], params["emb_mask"], params["emb_pad"])
    weight_specs = [
        pl.BlockSpec((1, BIN_NUM), full),
        pl.BlockSpec((1, BIN_NUM), full),
        pl.BlockSpec((BIN_NUM, BIN_NUM), full),
        pl.BlockSpec((1, BIN_NUM), full),
        pl.BlockSpec((BIN_NUM, D), full),
        pl.BlockSpec((1, D), full),
        pl.BlockSpec((1, D), full),
    ]
    if add_bias is not None:
        kernel = _autobin_kernel_bias
        args = (v, _pad_rows(add_bias, Tp)) + weight_args
        in_specs = [pl.BlockSpec((TM, 1), row), pl.BlockSpec((TM, D), row)] + weight_specs
    else:
        # no-bias variant: avoids allocating / streaming a (T, D) zeros array
        kernel = _autobin_kernel_nobias
        args = (v,) + weight_args
        in_specs = [pl.BlockSpec((TM, 1), row)] + weight_specs

    out = pl.pallas_call(
        kernel,
        out_shape=jax.ShapeDtypeStruct((Tp, D), jnp.float32),
        grid_spec=pltpu.PrefetchScalarGridSpec(
            num_scalar_prefetch=0,
            grid=(Tp // TM,),
            in_specs=in_specs,
            out_specs=pl.BlockSpec((TM, D), row),
        ),
        compiler_params=pltpu.CompilerParams(dimension_semantics=("parallel",)),
    )(*args)
    return out[:T]


# ---------------- Kernel B: decoder embed + LayerNorm + to_final ----------------
def _decoder_head_kernel(d_ref, pos_ref, wdet_ref, bde_ref, gamma_ref, beta_ref,
                         wft_row_ref, bf_ref, out_ref):
    h = d_ref[...] + pos_ref[...]                      # decoder_data += position_emb
    h = _mm(h, wdet_ref[...]) + bde_ref[...]           # decoder_embed
    # TODO(synk): self.decoder is None in MaeAutobin.__init__ (injected externally);
    # identity pass-through here.
    mu = jnp.mean(h, axis=-1, keepdims=True)
    var = jnp.maximum(jnp.mean(h * h, axis=-1, keepdims=True) - mu * mu, 0.0)
    hn = (h - mu) * jax.lax.rsqrt(var + LN_EPS)
    hn = hn * gamma_ref[...] + beta_ref[...]
    # to_final Linear(Dd, 1) as a VPU multiply + lane reduction (no skinny MXU call)
    out_ref[...] = jnp.sum(hn * wft_row_ref[...], axis=-1, keepdims=True) + bf_ref[...]


def decoder_head(params, d_flat, pos_flat):
    """d_flat, pos_flat: (T, EMBED_DIM) f32 -> (T,) f32."""
    T = d_flat.shape[0]
    E, Dd = EMBED_DIM, DEC_EMBED_DIM
    TM, Tp = _pick_tile(T)
    d = _pad_rows(d_flat, Tp)
    p = _pad_rows(pos_flat, Tp)
    full = lambda i: (0, 0)
    row = lambda i: (i, 0)
    out = pl.pallas_call(
        _decoder_head_kernel,
        out_shape=jax.ShapeDtypeStruct((Tp, 1), jnp.float32),
        grid_spec=pltpu.PrefetchScalarGridSpec(
            num_scalar_prefetch=0,
            grid=(Tp // TM,),
            in_specs=[
                pl.BlockSpec((TM, E), row),
                pl.BlockSpec((TM, E), row),
                pl.BlockSpec((E, Dd), full),
                pl.BlockSpec((1, Dd), full),
                pl.BlockSpec((1, Dd), full),
                pl.BlockSpec((1, Dd), full),
                pl.BlockSpec((1, Dd), full),   # to_final weight as a row vector
                pl.BlockSpec((1, 1), full),
            ],
            out_specs=pl.BlockSpec((TM, 1), row),
        ),
        compiler_params=pltpu.CompilerParams(dimension_semantics=("parallel",)),
    )(d, p, params["wdet"], params["bde"], params["gamma"], params["beta"],
      params["wft"].reshape(1, Dd), params["bf"])
    return out[:T, 0]


# ---------------- JAX glue ----------------
def scatter_encoder_to_decoder(dec_emb, enc_out, padding_label, encoder_labels):
    """decoder_data[encoder_labels] = x[~padding_label], row-major pairing (as PyTorch).
    NOTE: PyTorch errors if per-batch counts mismatch; this version silently clips."""
    b, n, D = enc_out.shape
    _, m, _ = dec_emb.shape
    enc_flat = (~padding_label).reshape(-1)                       # (b*n,)
    x_flat = enc_out.reshape(b * n, D)
    rank_enc = jnp.cumsum(enc_flat.astype(jnp.int32)) - 1
    scatter_idx = jnp.where(enc_flat, rank_enc, b * n)            # OOB -> drop
    rank_to_src = jnp.zeros((b * n,), jnp.int32).at[scatter_idx].set(
        jnp.arange(b * n, dtype=jnp.int32), mode="drop")
    dec_flat = encoder_labels.reshape(-1)                         # (b*m,)
    rank_dec = jnp.clip(jnp.cumsum(dec_flat.astype(jnp.int32)) - 1, 0, b * n - 1)
    gathered = x_flat[rank_to_src[rank_dec]]                      # (b*m, D)
    out = jnp.where(dec_flat[:, None], gathered, dec_emb.reshape(b * m, D))
    return out.reshape(b, m, D)


def mae_autobin_forward(params, x_vals, padding_label, enc_pos_ids, encoder_labels,
                        dec_vals, dec_pos_ids, dec_padding):
    b, n = x_vals.shape
    _, m = dec_vals.shape
    D = EMBED_DIM
    pos_enc = params["pos"][enc_pos_ids]                          # embedding gather (glue)
    pos_dec = params["pos"][dec_pos_ids]
    # encoder branch: token_emb + positional embedding (fused in kernel A)
    enc_emb = autobin_embed(params, x_vals.reshape(-1, 1),
                            add_bias=pos_enc.reshape(-1, D)).reshape(b, n, D)
    # TODO(synk): self.encoder is None in MaeAutobin.__init__ (injected externally);
    # identity pass-through here.
    x = enc_emb
    # decoder branch: token_emb only (positional embedding added AFTER scatter);
    # no-bias kernel variant -> no (b*m, D) zeros HBM round-trip.
    dec_emb = autobin_embed(params, dec_vals.reshape(-1, 1)).reshape(b, m, D)
    dec_emb = scatter_encoder_to_decoder(dec_emb, x, padding_label, encoder_labels)
    out = decoder_head(params, dec_emb.reshape(-1, D), pos_dec.reshape(-1, D))
    return out.reshape(b, m)                                      # .squeeze(2)


# ---------------- pure-JAX reference (for correctness check) ----------------
def reference_forward(params, x_vals, padding_label, enc_pos_ids, encoder_labels,
                      dec_vals, dec_pos_ids):
    def autobin(v):
        v3 = v[..., None]
        h = v3 * params["w1t"] + params["b1"]
        h = jnp.where(h >= 0.0, h, 0.1 * h)
        h2 = h @ params["w2t"] + params["b2"]
        h = BIN_ALPHA * h + h2
        w = jax.nn.softmax(h, axis=-1)
        e = w @ params["emb"]
        e = jnp.where(v3 == MASK_TOKEN_ID, params["emb_mask"], e)
        e = jnp.where(v3 == PAD_TOKEN_ID, params["emb_pad"], e)
        return e

    x = autobin(x_vals) + params["pos"][enc_pos_ids]
    d = autobin(dec_vals)
    d = scatter_encoder_to_decoder(d, x, padding_label, encoder_labels)
    d = d + params["pos"][dec_pos_ids]
    h = d @ params["wdet"] + params["bde"]
    mu = h.mean(-1, keepdims=True)
    var = ((h - mu) ** 2).mean(-1, keepdims=True)
    hn = (h - mu) / jnp.sqrt(var + LN_EPS) * params["gamma"] + params["beta"]
    return (hn @ params["wft"] + params["bf"])[..., 0]


def init_params(key):
    ks = jax.random.split(key, 12)
    nrm = lambda k, s: (0.02 * jax.random.normal(k, s)).astype(jnp.float32)
    return dict(
        w1t=nrm(ks[0], (1, BIN_NUM)),            # mlp: Linear(1, bin_num).weight.T
        b1=nrm(ks[1], (1, BIN_NUM)),
        w2t=nrm(ks[2], (BIN_NUM, BIN_NUM)),      # mlp2.weight.T
        b2=nrm(ks[3], (1, BIN_NUM)),
        emb=nrm(ks[4], (BIN_NUM, EMBED_DIM)),    # nn.Embedding(bin_num, dim)
        emb_mask=nrm(ks[5], (1, EMBED_DIM)),
        emb_pad=nrm(ks[6], (1, EMBED_DIM)),
        pos=nrm(ks[7], (MAX_SEQ_LEN + 1, EMBED_DIM)),
        wdet=nrm(ks[8], (EMBED_DIM, DEC_EMBED_DIM)),  # decoder_embed.weight.T
        bde=nrm(ks[9], (1, DEC_EMBED_DIM)),
        gamma=jnp.ones((1, DEC_EMBED_DIM), jnp.float32),
        beta=jnp.zeros((1, DEC_EMBED_DIM), jnp.float32),
        wft=nrm(ks[10], (DEC_EMBED_DIM, 1)),          # to_final.weight.T
        bf=nrm(ks[11], (1, 1)),
    )


if __name__ == "__main__":
    key = jax.random.PRNGKey(0)
    kp, kx, kd, kpe, kpd = jax.random.split(key, 5)
    params = init_params(kp)

    b, n_enc, n_dec = 2, 8, 16
    padding_label = jnp.array([[0, 0, 0, 0, 0, 0, 1, 1],
                               [0, 0, 0, 0, 0, 0, 0, 1]], dtype=bool)
    x_vals = jax.random.uniform(kx, (b, n_enc), minval=0.0, maxval=5.0).astype(jnp.float32)
    x_vals = jnp.where(padding_label, PAD_TOKEN_ID, x_vals)
    x_vals = x_vals.at[0, 1].set(MASK_TOKEN_ID)

    # per-batch True count in encoder_labels == per-batch non-padded encoder count (6, 7)
    encoder_labels = jnp.zeros((b, n_dec), bool).at[0, :6].set(True).at[1, 2:9].set(True)

    dec_vals = jax.random.uniform(kd, (b, n_dec), minval=0.0, maxval=5.0).astype(jnp.float32)
    dec_vals = jnp.where(encoder_labels, MASK_TOKEN_ID, dec_vals)
    dec_padding = jnp.zeros((b, n_dec), bool).at[1, 14:].set(True)
    dec_vals = jnp.where(dec_padding, PAD_TOKEN_ID, dec_vals)

    enc_pos_ids = jax.random.randint(kpe, (b, n_enc), 0, MAX_SEQ_LEN + 1)
    dec_pos_ids = jax.random.randint(kpd, (b, n_dec), 0, MAX_SEQ_LEN + 1)

    out = jax.jit(mae_autobin_forward)(params, x_vals, padding_label, enc_pos_ids,
                                       encoder_labels, dec_vals, dec_pos_ids, dec_padding)
    out = jax.block_until_ready(out)
    ref = reference_forward(params, x_vals, padding_label, enc_pos_ids,
                            encoder_labels, dec_vals, dec_pos_ids)
    assert out.shape == (b, n_dec)
    # tolerance accounts for the EUP approximate-reciprocal softmax in the kernel
    assert jnp.allclose(out, ref, atol=1e-3, rtol=1e-3), (out, ref)
    print("KERNEL_OK")
</pallas_src>

<mosaic_0001>
module attributes {stable_mosaic.version = 11 : i64} {
  func.func @_autobin_kernel_bias(%arg0: i32, %arg1: memref<16x1xf32, #tpu.memory_space<vmem>>, %arg2: memref<16x32xf32, #tpu.memory_space<vmem>>, %arg3: memref<1x10xf32, #tpu.memory_space<vmem>>, %arg4: memref<1x10xf32, #tpu.memory_space<vmem>>, %arg5: memref<10x10xf32, #tpu.memory_space<vmem>>, %arg6: memref<1x10xf32, #tpu.memory_space<vmem>>, %arg7: memref<10x32xf32, #tpu.memory_space<vmem>>, %arg8: memref<1x32xf32, #tpu.memory_space<vmem>>, %arg9: memref<1x32xf32, #tpu.memory_space<vmem>>, %arg10: memref<16x32xf32, #tpu.memory_space<vmem>>) attributes {dimension_semantics = [#tpu.dimension_semantics<parallel>], iteration_bounds = array<i64: 1>, scalar_prefetch = 0 : i64, scratch_operands = 0 : i64, tpu.core_type = #tpu.core_type<tc>, window_params = [{transform_indices = @transform_0, window_bounds = array<i64: 16, 1>}, {transform_indices = @transform_1, window_bounds = array<i64: 16, 32>}, {pipeline_mode = #tpu.pipeline_mode<synchronous>, transform_indices = @transform_2, window_bounds = array<i64: 1, 10>}, {pipeline_mode = #tpu.pipeline_mode<synchronous>, transform_indices = @transform_3, window_bounds = array<i64: 1, 10>}, {pipeline_mode = #tpu.pipeline_mode<synchronous>, transform_indices = @transform_4, window_bounds = array<i64: 10, 10>}, {pipeline_mode = #tpu.pipeline_mode<synchronous>, transform_indices = @transform_5, window_bounds = array<i64: 1, 10>}, {pipeline_mode = #tpu.pipeline_mode<synchronous>, transform_indices = @transform_6, window_bounds = array<i64: 10, 32>}, {pipeline_mode = #tpu.pipeline_mode<synchronous>, transform_indices = @transform_7, window_bounds = array<i64: 1, 32>}, {pipeline_mode = #tpu.pipeline_mode<synchronous>, transform_indices = @transform_8, window_bounds = array<i64: 1, 32>}, {transform_indices = @transform_9, window_bounds = array<i64: 16, 32>}]} {
    %c0 = arith.constant 0 : index
    %c0_0 = arith.constant 0 : index
    %0 = vector.load %arg1[%c0, %c0_0] : memref<16x1xf32, #tpu.memory_space<vmem>>, vector<16x1xf32>
    %c0_1 = arith.constant 0 : index
    %c0_2 = arith.constant 0 : index
    %1 = vector.load %arg3[%c0_1, %c0_2] : memref<1x10xf32, #tpu.memory_space<vmem>>, vector<1x10xf32>
    %c0_3 = arith.constant 0 : index
    %c0_4 = arith.constant 0 : index
    %2 = vector.load %arg4[%c0_3, %c0_4] : memref<1x10xf32, #tpu.memory_space<vmem>>, vector<1x10xf32>
    %c0_5 = arith.constant 0 : index
    %c0_6 = arith.constant 0 : index
    %3 = vector.load %arg5[%c0_5, %c0_6] : memref<10x10xf32, #tpu.memory_space<vmem>>, vector<10x10xf32>
    %c0_7 = arith.constant 0 : index
    %c0_8 = arith.constant 0 : index
    %4 = vector.load %arg6[%c0_7, %c0_8] : memref<1x10xf32, #tpu.memory_space<vmem>>, vector<1x10xf32>
    %c0_9 = arith.constant 0 : index
    %c0_10 = arith.constant 0 : index
    %5 = vector.load %arg7[%c0_9, %c0_10] : memref<10x32xf32, #tpu.memory_space<vmem>>, vector<10x32xf32>
    %c0_11 = arith.constant 0 : index
    %c0_12 = arith.constant 0 : index
    %6 = vector.load %arg8[%c0_11, %c0_12] : memref<1x32xf32, #tpu.memory_space<vmem>>, vector<1x32xf32>
    %c0_13 = arith.constant 0 : index
    %c0_14 = arith.constant 0 : index
    %7 = vector.load %arg9[%c0_13, %c0_14] : memref<1x32xf32, #tpu.memory_space<vmem>>, vector<1x32xf32>
    %8 = vector.broadcast %0 : vector<16x1xf32> to vector<16x10xf32>
    %9 = vector.broadcast %1 : vector<1x10xf32> to vector<16x10xf32>
    %10 = arith.mulf %8, %9 : vector<16x10xf32>
    %11 = vector.broadcast %2 : vector<1x10xf32> to vector<16x10xf32>
    %12 = arith.addf %10, %11 : vector<16x10xf32>
    %cst = arith.constant 0.000000e+00 : f32
    %13 = vector.broadcast %cst : f32 to vector<16x10xf32>
    %14 = arith.cmpf oge, %12, %13 : vector<16x10xf32>
    %cst_15 = arith.constant 1.000000e-01 : f32
    %15 = vector.broadcast %cst_15 : f32 to vector<16x10xf32>
    %16 = arith.mulf %15, %12 : vector<16x10xf32>
    %17 = arith.select %14, %12, %16 : vector<16x10xi1>, vector<16x10xf32>
    %cst_16 = arith.constant dense<0.000000e+00> : vector<16x10xf32>
    %18 = tpu.matmul %17, %3, %cst_16 {dimension_numbers = #tpu.dot_dimension_numbers<[1], [0], [0], [1], [0, 0, 1, 1], [], []>} : vector<16x10xf32>, vector<10x10xf32>, vector<16x10xf32> -> vector<16x10xf32>
    %19 = vector.broadcast %4 : vector<1x10xf32> to vector<16x10xf32>
    %20 = arith.addf %18, %19 : vector<16x10xf32>
    %cst_17 = arith.constant 1.000000e+00 : f32
    %21 = vector.broadcast %cst_17 : f32 to vector<16x10xf32>
    %22 = arith.mulf %21, %17 : vector<16x10xf32>
    %23 = arith.addf %22, %20 : vector<16x10xf32>
    %cst_18 = arith.constant dense<0xFF800000> : vector<16xf32>
    %24 = vector.multi_reduction <maximumf>, %23, %cst_18 [1] : vector<16x10xf32> to vector<16xf32>
    %25 = vector.shape_cast %24 : vector<16xf32> to vector<16x1xf32>
    %26 = vector.broadcast %25 : vector<16x1xf32> to vector<16x10xf32>
    %27 = arith.subf %23, %26 : vector<16x10xf32>
    %28 = math.exp %27 : vector<16x10xf32>
    %cst_19 = arith.constant dense<0.000000e+00> : vector<16xf32>
    %29 = vector.multi_reduction <add>, %28, %cst_19 [1] : vector<16x10xf32> to vector<16xf32>
    %30 = vector.shape_cast %29 : vector<16xf32> to vector<16x1xf32>
    %31 = tpu.reciprocal %30 {approx = true} : vector<16x1xf32> -> vector<16x1xf32>
    %32 = vector.broadcast %31 : vector<16x1xf32> to vector<16x10xf32>
    %33 = arith.mulf %28, %32 : vector<16x10xf32>
    %cst_20 = arith.constant dense<0.000000e+00> : vector<16x32xf32>
    %34 = tpu.matmul %33, %5, %cst_20 {dimension_numbers = #tpu.dot_dimension_numbers<[1], [0], [0], [1], [0, 0, 1, 1], [], []>} : vector<16x10xf32>, vector<10x32xf32>, vector<16x32xf32> -> vector<16x32xf32>
    %cst_21 = arith.constant 1.020000e+02 : f32
    %35 = vector.broadcast %cst_21 : f32 to vector<16x1xf32>
    %36 = arith.cmpf oeq, %0, %35 : vector<16x1xf32>
    %37 = vector.shape_cast %36 : vector<16x1xi1> to vector<16x1xi1>
    %38 = vector.broadcast %37 : vector<16x1xi1> to vector<16x32xi1>
    %39 = vector.shape_cast %6 : vector<1x32xf32> to vector<1x32xf32>
    %40 = vector.broadcast %39 : vector<1x32xf32> to vector<16x32xf32>
    %41 = arith.select %38, %40, %34 : vector<16x32xi1>, vector<16x32xf32>
    %cst_22 = arith.constant 1.030000e+02 : f32
    %42 = vector.broadcast %cst_22 : f32 to vector<16x1xf32>
    %43 = arith.cmpf oeq, %0, %42 : vector<16x1xf32>
    %44 = vector.shape_cast %43 : vector<16x1xi1> to vector<16x1xi1>
    %45 = vector.broadcast %44 : vector<16x1xi1> to vector<16x32xi1>
    %46 = vector.shape_cast %7 : vector<1x32xf32> to vector<1x32xf32>
    %47 = vector.broadcast %46 : vector<1x32xf32> to vector<16x32xf32>
    %48 = arith.select %45, %47, %41 : vector<16x32xi1>, vector<16x32xf32>
    %c0_23 = arith.constant 0 : index
    %c0_24 = arith.constant 0 : index
    %49 = vector.load %arg2[%c0_23, %c0_24] : memref<16x32xf32, #tpu.memory_space<vmem>>, vector<16x32xf32>
    %50 = arith.addf %48, %49 : vector<16x32xf32>
    %c0_25 = arith.constant 0 : index
    %c0_26 = arith.constant 0 : index
    %51 = vector.load %arg10[%c0_25, %c0_26] : memref<16x32xf32, #tpu.memory_space<vmem>>, vector<16x32xf32>
    tpu.vector_store %arg10[%c0_25, %c0_26], %50 {strides = array<i32>} : memref<16x32xf32, #tpu.memory_space<vmem>>, vector<16x32xf32>,
    return
  }
  func.func @transform_0(%arg0: i32) -> (i32, i32) {
    %c0_i32 = arith.constant 0 : i32
    %c0_i32_0 = arith.constant 0 : i32
    return %arg0, %c0_i32 : i32, i32
  }
  func.func @transform_1(%arg0: i32) -> (i32, i32) {
    %c0_i32 = arith.constant 0 : i32
    %c0_i32_0 = arith.constant 0 : i32
    return %arg0, %c0_i32 : i32, i32
  }
  func.func @transform_2(%arg0: i32) -> (i32, i32) {
    %c0_i32 = arith.constant 0 : i32
    %c0_i32_0 = arith.constant 0 : i32
    %c0_i32_1 = arith.constant 0 : i32
    return %c0_i32, %c0_i32_0 : i32, i32
  }
  func.func @transform_3(%arg0: i32) -> (i32, i32) {
    %c0_i32 = arith.constant 0 : i32
    %c0_i32_0 = arith.constant 0 : i32
    %c0_i32_1 = arith.constant 0 : i32
    return %c0_i32, %c0_i32_0 : i32, i32
  }
  func.func @transform_4(%arg0: i32) -> (i32, i32) {
    %c0_i32 = arith.constant 0 : i32
    %c0_i32_0 = arith.constant 0 : i32
    %c0_i32_1 = arith.constant 0 : i32
    return %c0_i32, %c0_i32_0 : i32, i32
  }
  func.func @transform_5(%arg0: i32) -> (i32, i32) {
    %c0_i32 = arith.constant 0 : i32
    %c0_i32_0 = arith.constant 0 : i32
    %c0_i32_1 = arith.constant 0 : i32
    return %c0_i32, %c0_i32_0 : i32, i32
  }
  func.func @transform_6(%arg0: i32) -> (i32, i32) {
    %c0_i32 = arith.constant 0 : i32
    %c0_i32_0 = arith.constant 0 : i32
    %c0_i32_1 = arith.constant 0 : i32
    return %c0_i32, %c0_i32_0 : i32, i32
  }
  func.func @transform_7(%arg0: i32) -> (i32, i32) {
    %c0_i32 = arith.constant 0 : i32
    %c0_i32_0 = arith.constant 0 : i32
    %c0_i32_1 = arith.constant 0 : i32
    return %c0_i32, %c0_i32_0 : i32, i32
  }
  func.func @transform_8(%arg0: i32) -> (i32, i32) {
    %c0_i32 = arith.constant 0 : i32
    %c0_i32_0 = arith.constant 0 : i32
    %c0_i32_1 = arith.constant 0 : i32
    return %c0_i32, %c0_i32_0 : i32, i32
  }
  func.func @transform_9(%arg0: i32) -> (i32, i32) {
    %c0_i32 = arith.constant 0 : i32
    %c0_i32_0 = arith.constant 0 : i32
    return %arg0, %c0_i32 : i32, i32
  }
}

module attributes {stable_mosaic.version = 11 : i64} {
  func.func @_autobin_kernel_nobias(%arg0: i32, %arg1: memref<32x1xf32, #tpu.memory_space<vmem>>, %arg2: memref<1x10xf32, #tpu.memory_space<vmem>>, %arg3: memref<1x10xf32, #tpu.memory_space<vmem>>, %arg4: memref<10x10xf32, #tpu.memory_space<vmem>>, %arg5: memref<1x10xf32, #tpu.memory_space<vmem>>, %arg6: memref<10x32xf32, #tpu.memory_space<vmem>>, %arg7: memref<1x32xf32, #tpu.memory_space<vmem>>, %arg8: memref<1x32xf32, #tpu.memory_space<vmem>>, %arg9: memref<32x32xf32, #tpu.memory_space<vmem>>) attributes {dimension_semantics = [#tpu.dimension_semantics<parallel>], iteration_bounds = array<i64: 1>, scalar_prefetch = 0 : i64, scratch_operands = 0 : i64, tpu.core_type = #tpu.core_type<tc>, window_params = [{transform_indices = @transform_0, window_bounds = array<i64: 32, 1>}, {pipeline_mode = #tpu.pipeline_mode<synchronous>, transform_indices = @transform_1, window_bounds = array<i64: 1, 10>}, {pipeline_mode = #tpu.pipeline_mode<synchronous>, transform_indices = @transform_2, window_bounds = array<i64: 1, 10>}, {pipeline_mode = #tpu.pipeline_mode<synchronous>, transform_indices = @transform_3, window_bounds = array<i64: 10, 10>}, {pipeline_mode = #tpu.pipeline_mode<synchronous>, transform_indices = @transform_4, window_bounds = array<i64: 1, 10>}, {pipeline_mode = #tpu.pipeline_mode<synchronous>, transform_indices = @transform_5, window_bounds = array<i64: 10, 32>}, {pipeline_mode = #tpu.pipeline_mode<synchronous>, transform_indices = @transform_6, window_bounds = array<i64: 1, 32>}, {pipeline_mode = #tpu.pipeline_mode<synchronous>, transform_indices = @transform_7, window_bounds = array<i64: 1, 32>}, {transform_indices = @transform_8, window_bounds = array<i64: 32, 32>}]} {
    %c0 = arith.constant 0 : index
    %c0_0 = arith.constant 0 : index
    %0 = vector.load %arg1[%c0, %c0_0] : memref<32x1xf32, #tpu.memory_space<vmem>>, vector<32x1xf32>
    %c0_1 = arith.constant 0 : index
    %c0_2 = arith.constant 0 : index
    %1 = vector.load %arg2[%c0_1, %c0_2] : memref<1x10xf32, #tpu.memory_space<vmem>>, vector<1x10xf32>
    %c0_3 = arith.constant 0 : index
    %c0_4 = arith.constant 0 : index
    %2 = vector.load %arg3[%c0_3, %c0_4] : memref<1x10xf32, #tpu.memory_space<vmem>>, vector<1x10xf32>
    %c0_5 = arith.constant 0 : index
    %c0_6 = arith.constant 0 : index
    %3 = vector.load %arg4[%c0_5, %c0_6] : memref<10x10xf32, #tpu.memory_space<vmem>>, vector<10x10xf32>
    %c0_7 = arith.constant 0 : index
    %c0_8 = arith.constant 0 : index
    %4 = vector.load %arg5[%c0_7, %c0_8] : memref<1x10xf32, #tpu.memory_space<vmem>>, vector<1x10xf32>
    %c0_9 = arith.constant 0 : index
    %c0_10 = arith.constant 0 : index
    %5 = vector.load %arg6[%c0_9, %c0_10] : memref<10x32xf32, #tpu.memory_space<vmem>>, vector<10x32xf32>
    %c0_11 = arith.constant 0 : index
    %c0_12 = arith.constant 0 : index
    %6 = vector.load %arg7[%c0_11, %c0_12] : memref<1x32xf32, #tpu.memory_space<vmem>>, vector<1x32xf32>
    %c0_13 = arith.constant 0 : index
    %c0_14 = arith.constant 0 : index
    %7 = vector.load %arg8[%c0_13, %c0_14] : memref<1x32xf32, #tpu.memory_space<vmem>>, vector<1x32xf32>
    %8 = vector.broadcast %0 : vector<32x1xf32> to vector<32x10xf32>
    %9 = vector.broadcast %1 : vector<1x10xf32> to vector<32x10xf32>
    %10 = arith.mulf %8, %9 : vector<32x10xf32>
    %11 = vector.broadcast %2 : vector<1x10xf32> to vector<32x10xf32>
    %12 = arith.addf %10, %11 : vector<32x10xf32>
    %cst = arith.constant 0.000000e+00 : f32
    %13 = vector.broadcast %cst : f32 to vector<32x10xf32>
    %14 = arith.cmpf oge, %12, %13 : vector<32x10xf32>
    %cst_15 = arith.constant 1.000000e-01 : f32
    %15 = vector.broadcast %cst_15 : f32 to vector<32x10xf32>
    %16 = arith.mulf %15, %12 : vector<32x10xf32>
    %17 = arith.select %14, %12, %16 : vector<32x10xi1>, vector<32x10xf32>
    %cst_16 = arith.constant dense<0.000000e+00> : vector<32x10xf32>
    %18 = tpu.matmul %17, %3, %cst_16 {dimension_numbers = #tpu.dot_dimension_numbers<[1], [0], [0], [1], [0, 0, 1, 1], [], []>} : vector<32x10xf32>, vector<10x10xf32>, vector<32x10xf32> -> vector<32x10xf32>
    %19 = vector.broadcast %4 : vector<1x10xf32> to vector<32x10xf32>
    %20 = arith.addf %18, %19 : vector<32x10xf32>
    %cst_17 = arith.constant 1.000000e+00 : f32
    %21 = vector.broadcast %cst_17 : f32 to vector<32x10xf32>
    %22 = arith.mulf %21, %17 : vector<32x10xf32>
    %23 = arith.addf %22, %20 : vector<32x10xf32>
    %cst_18 = arith.constant dense<0xFF800000> : vector<32xf32>
    %24 = vector.multi_reduction <maximumf>, %23, %cst_18 [1] : vector<32x10xf32> to vector<32xf32>
    %25 = vector.shape_cast %24 : vector<32xf32> to vector<32x1xf32>
    %26 = vector.broadcast %25 : vector<32x1xf32> to vector<32x10xf32>
    %27 = arith.subf %23, %26 : vector<32x10xf32>
    %28 = math.exp %27 : vector<32x10xf32>
    %cst_19 = arith.constant dense<0.000000e+00> : vector<32xf32>
    %29 = vector.multi_reduction <add>, %28, %cst_19 [1] : vector<32x10xf32> to vector<32xf32>
    %30 = vector.shape_cast %29 : vector<32xf32> to vector<32x1xf32>
    %31 = tpu.reciprocal %30 {approx = true} : vector<32x1xf32> -> vector<32x1xf32>
    %32 = vector.broadcast %31 : vector<32x1xf32> to vector<32x10xf32>
    %33 = arith.mulf %28, %32 : vector<32x10xf32>
    %cst_20 = arith.constant dense<0.000000e+00> : vector<32x32xf32>
    %34 = tpu.matmul %33, %5, %cst_20 {dimension_numbers = #tpu.dot_dimension_numbers<[1], [0], [0], [1], [0, 0, 1, 1], [], []>} : vector<32x10xf32>, vector<10x32xf32>, vector<32x32xf32> -> vector<32x32xf32>
    %cst_21 = arith.constant 1.020000e+02 : f32
    %35 = vector.broadcast %cst_21 : f32 to vector<32x1xf32>
    %36 = arith.cmpf oeq, %0, %35 : vector<32x1xf32>
    %37 = vector.shape_cast %36 : vector<32x1xi1> to vector<32x1xi1>
    %38 = vector.broadcast %37 : vector<32x1xi1> to vector<32x32xi1>
    %39 = vector.shape_cast %6 : vector<1x32xf32> to vector<1x32xf32>
    %40 = vector.broadcast %39 : vector<1x32xf32> to vector<32x32xf32>
    %41 = arith.select %38, %40, %34 : vector<32x32xi1>, vector<32x32xf32>
    %cst_22 = arith.constant 1.030000e+02 : f32
    %42 = vector.broadcast %cst_22 : f32 to vector<32x1xf32>
    %43 = arith.cmpf oeq, %0, %42 : vector<32x1xf32>
    %44 = vector.shape_cast %43 : vector<32x1xi1> to vector<32x1xi1>
    %45 = vector.broadcast %44 : vector<32x1xi1> to vector<32x32xi1>
    %46 = vector.shape_cast %7 : vector<1x32xf32> to vector<1x32xf32>
    %47 = vector.broadcast %46 : vector<1x32xf32> to vector<32x32xf32>
    %48 = arith.select %45, %47, %41 : vector<32x32xi1>, vector<32x32xf32>
    %c0_23 = arith.constant 0 : index
    %c0_24 = arith.constant 0 : index
    %49 = vector.load %arg9[%c0_23, %c0_24] : memref<32x32xf32, #tpu.memory_space<vmem>>, vector<32x32xf32>
    tpu.vector_store %arg9[%c0_23, %c0_24], %48 {strides = array<i32>} : memref<32x32xf32, #tpu.memory_space<vmem>>, vector<32x32xf32>,
    return
  }
  func.func @transform_0(%arg0: i32) -> (i32, i32) {
    %c0_i32 = arith.constant 0 : i32
    %c0_i32_0 = arith.constant 0 : i32
    return %arg0, %c0_i32 : i32, i32
  }
  func.func @transform_1(%arg0: i32) -> (i32, i32) {
    %c0_i32 = arith.constant 0 : i32
    %c0_i32_0 = arith.constant 0 : i32
    %c0_i32_1 = arith.constant 0 : i32
    return %c0_i32, %c0_i32_0 : i32, i32
  }
  func.func @transform_2(%arg0: i32) -> (i32, i32) {
    %c0_i32 = arith.constant 0 : i32
    %c0_i32_0 = arith.constant 0 : i32
    %c0_i32_1 = arith.constant 0 : i32
    return %c0_i32, %c0_i32_0 : i32, i32
  }
  func.func @transform_3(%arg0: i32) -> (i32, i32) {
    %c0_i32 = arith.constant 0 : i32
    %c0_i32_0 = arith.constant 0 : i32
    %c0_i32_1 = arith.constant 0 : i32
    return %c0_i32, %c0_i32_0 : i32, i32
  }
  func.func @transform_4(%arg0: i32) -> (i32, i32) {
    %c0_i32 = arith.constant 0 : i32
    %c0_i32_0 = arith.constant 0 : i32
    %c0_i32_1 = arith.constant 0 : i32
    return %c0_i32, %c0_i32_0 : i32, i32
  }
  func.func @transform_5(%arg0: i32) -> (i32, i32) {
    %c0_i32 = arith.constant 0 : i32
    %c0_i32_0 = arith.constant 0 : i32
    %c0_i32_1 = arith.constant 0 : i32
    return %c0_i32, %c0_i32_0 : i32, i32
  }
  func.func @transform_6(%arg0: i32) -> (i32, i32) {
    %c0_i32 = arith.constant 0 : i32
    %c0_i32_0 = arith.constant 0 : i32
    %c0_i32_1 = arith.constant 0 : i32
    return %c0_i32, %c0_i32_0 : i32, i32
  }
  func.func @transform_7(%arg0: i32) -> (i32, i32) {
    %c0_i32 = arith.constant 0 : i32
    %c0_i32_0 = arith.constant 0 : i32
    %c0_i32_1 = arith.constant 0 : i32
    return %c0_i32, %c0_i32_0 : i32, i32
  }
  func.func @transform_8(%arg0: i32) -> (i32, i32) {
    %c0_i32 = arith.constant 0 : i32
    %c0_i32_0 = arith.constant 0 : i32
    return %arg0, %c0_i32 : i32, i32
  }
}

module attributes {stable_mosaic.version = 11 : i64} {
  func.func @_decoder_head_kernel(%arg0: i32, %arg1: memref<32x32xf32, #tpu.memory_space<vmem>>, %arg2: memref<32x32xf32, #tpu.memory_space<vmem>>, %arg3: memref<32x32xf32, #tpu.memory_space<vmem>>, %arg4: memref<1x32xf32, #tpu.memory_space<vmem>>, %arg5: memref<1x32xf32, #tpu.memory_space<vmem>>, %arg6: memref<1x32xf32, #tpu.memory_space<vmem>>, %arg7: memref<1x32xf32, #tpu.memory_space<vmem>>, %arg8: memref<1x1xf32, #tpu.memory_space<vmem>>, %arg9: memref<32x1xf32, #tpu.memory_space<vmem>>) attributes {dimension_semantics = [#tpu.dimension_semantics<parallel>], iteration_bounds = array<i64: 1>, scalar_prefetch = 0 : i64, scratch_operands = 0 : i64, tpu.core_type = #tpu.core_type<tc>, window_params = [{transform_indices = @transform_0, window_bounds = array<i64: 32, 32>}, {transform_indices = @transform_1, window_bounds = array<i64: 32, 32>}, {pipeline_mode = #tpu.pipeline_mode<synchronous>, transform_indices = @transform_2, window_bounds = array<i64: 32, 32>}, {pipeline_mode = #tpu.pipeline_mode<synchronous>, transform_indices = @transform_3, window_bounds = array<i64: 1, 32>}, {pipeline_mode = #tpu.pipeline_mode<synchronous>, transform_indices = @transform_4, window_bounds = array<i64: 1, 32>}, {pipeline_mode = #tpu.pipeline_mode<synchronous>, transform_indices = @transform_5, window_bounds = array<i64: 1, 32>}, {pipeline_mode = #tpu.pipeline_mode<synchronous>, transform_indices = @transform_6, window_bounds = array<i64: 1, 32>}, {pipeline_mode = #tpu.pipeline_mode<synchronous>, transform_indices = @transform_7, window_bounds = array<i64: 1, 1>}, {transform_indices = @transform_8, window_bounds = array<i64: 32, 1>}]} {
    %c0 = arith.constant 0 : index
    %c0_0 = arith.constant 0 : index
    %0 = vector.load %arg1[%c0, %c0_0] : memref<32x32xf32, #tpu.memory_space<vmem>>, vector<32x32xf32>
    %c0_1 = arith.constant 0 : index
    %c0_2 = arith.constant 0 : index
    %1 = vector.load %arg2[%c0_1, %c0_2] : memref<32x32xf32, #tpu.memory_space<vmem>>, vector<32x32xf32>
    %2 = arith.addf %0, %1 : vector<32x32xf32>
    %c0_3 = arith.constant 0 : index
    %c0_4 = arith.constant 0 : index
    %3 = vector.load %arg3[%c0_3, %c0_4] : memref<32x32xf32, #tpu.memory_space<vmem>>, vector<32x32xf32>
    %cst = arith.constant dense<0.000000e+00> : vector<32x32xf32>
    %4 = tpu.matmul %2, %3, %cst {dimension_numbers = #tpu.dot_dimension_numbers<[1], [0], [0], [1], [0, 0, 1, 1], [], []>} : vector<32x32xf32>, vector<32x32xf32>, vector<32x32xf32> -> vector<32x32xf32>
    %c0_5 = arith.constant 0 : index
    %c0_6 = arith.constant 0 : index
    %5 = vector.load %arg4[%c0_5, %c0_6] : memref<1x32xf32, #tpu.memory_space<vmem>>, vector<1x32xf32>
    %6 = vector.broadcast %5 : vector<1x32xf32> to vector<32x32xf32>
    %7 = arith.addf %4, %6 : vector<32x32xf32>
    %cst_7 = arith.constant dense<0.000000e+00> : vector<32xf32>
    %8 = vector.multi_reduction <add>, %7, %cst_7 [1] : vector<32x32xf32> to vector<32xf32>
    %9 = vector.shape_cast %8 : vector<32xf32> to vector<32x1xf32>
    %cst_8 = arith.constant 3.200000e+01 : f32
    %10 = vector.broadcast %cst_8 : f32 to vector<32x1xf32>
    %11 = arith.divf %9, %10 : vector<32x1xf32>
    %12 = arith.mulf %7, %7 : vector<32x32xf32>
    %cst_9 = arith.constant dense<0.000000e+00> : vector<32xf32>
    %13 = vector.multi_reduction <add>, %12, %cst_9 [1] : vector<32x32xf32> to vector<32xf32>
    %14 = vector.shape_cast %13 : vector<32xf32> to vector<32x1xf32>
    %cst_10 = arith.constant 3.200000e+01 : f32
    %15 = vector.broadcast %cst_10 : f32 to vector<32x1xf32>
    %16 = arith.divf %14, %15 : vector<32x1xf32>
    %17 = arith.mulf %11, %11 : vector<32x1xf32>
    %18 = arith.subf %16, %17 : vector<32x1xf32>
    %cst_11 = arith.constant 0.000000e+00 : f32
    %19 = vector.broadcast %cst_11 : f32 to vector<32x1xf32>
    %20 = arith.maximumf %18, %19 : vector<32x1xf32>
    %21 = vector.broadcast %11 : vector<32x1xf32> to vector<32x32xf32>
    %22 = arith.subf %7, %21 : vector<32x32xf32>
    %cst_12 = arith.constant 9.99999974E-6 : f32
    %23 = vector.broadcast %cst_12 : f32 to vector<32x1xf32>
    %24 = arith.addf %20, %23 : vector<32x1xf32>
    %25 = math.rsqrt %24 : vector<32x1xf32>
    %26 = vector.broadcast %25 : vector<32x1xf32> to vector<32x32xf32>
    %27 = arith.mulf %22, %26 : vector<32x32xf32>
    %c0_13 = arith.constant 0 : index
    %c0_14 = arith.constant 0 : index
    %28 = vector.load %arg5[%c0_13, %c0_14] : memref<1x32xf32, #tpu.memory_space<vmem>>, vector<1x32xf32>
    %29 = vector.broadcast %28 : vector<1x32xf32> to vector<32x32xf32>
    %30 = arith.mulf %27, %29 : vector<32x32xf32>
    %c0_15 = arith.constant 0 : index
    %c0_16 = arith.constant 0 : index
    %31 = vector.load %arg6[%c0_15, %c0_16] : memref<1x32xf32, #tpu.memory_space<vmem>>, vector<1x32xf32>
    %32 = vector.broadcast %31 : vector<1x32xf32> to vector<32x32xf32>
    %33 = arith.addf %30, %32 : vector<32x32xf32>
    %c0_17 = arith.constant 0 : index
    %c0_18 = arith.constant 0 : index
    %34 = vector.load %arg7[%c0_17, %c0_18] : memref<1x32xf32, #tpu.memory_space<vmem>>, vector<1x32xf32>
    %35 = vector.broadcast %34 : vector<1x32xf32> to vector<32x32xf32>
    %36 = arith.mulf %33, %35 : vector<32x32xf32>
    %cst_19 = arith.constant dense<0.000000e+00> : vector<32xf32>
    %37 = vector.multi_reduction <add>, %36, %cst_19 [1] : vector<32x32xf32> to vector<32xf32>
    %38 = vector.shape_cast %37 : vector<32xf32> to vector<32x1xf32>
    %c0_20 = arith.constant 0 : index
    %c0_21 = arith.constant 0 : index
    %39 = vector.load %arg8[%c0_20, %c0_21] : memref<1x1xf32, #tpu.memory_space<vmem>>, vector<1x1xf32>
    %40 = vector.broadcast %39 : vector<1x1xf32> to vector<32x1xf32>
    %41 = arith.addf %38, %40 : vector<32x1xf32>
    %c0_22 = arith.constant 0 : index
    %c0_23 = arith.constant 0 : index
    %42 = vector.load %arg9[%c0_22, %c0_23] : memref<32x1xf32, #tpu.memory_space<vmem>>, vector<32x1xf32>
    tpu.vector_store %arg9[%c0_22, %c0_23], %41 {strides = array<i32>} : memref<32x1xf32, #tpu.memory_space<vmem>>, vector<32x1xf32>,
    return
  }
  func.func @transform_0(%arg0: i32) -> (i32, i32) {
    %c0_i32 = arith.constant 0 : i32
    %c0_i32_0 = arith.constant 0 : i32
    return %arg0, %c0_i32 : i32, i32
  }
  func.func @transform_1(%arg0: i32) -> (i32, i32) {
    %c0_i32 = arith.constant 0 : i32
    %c0_i32_0 = arith.constant 0 : i32
    return %arg0, %c0_i32 : i32, i32
  }
  func.func @transform_2(%arg0: i32) -> (i32, i32) {
    %c0_i32 = arith.constant 0 : i32
    %c0_i32_0 = arith.constant 0 : i32
    %c0_i32_1 = arith.constant 0 : i32
    return %c0_i32, %c0_i32_0 : i32, i32
  }
  func.func @transform_3(%arg0: i32) -> (i32, i32) {
    %c0_i32 = arith.constant 0 : i32
    %c0_i32_0 = arith.constant 0 : i32
    %c0_i32_1 = arith.constant 0 : i32
    return %c0_i32, %c0_i32_0 : i32, i32
  }
  func.func @transform_4(%arg0: i32) -> (i32, i32) {
    %c0_i32 = arith.constant 0 : i32
    %c0_i32_0 = arith.constant 0 : i32
    %c0_i32_1 = arith.constant 0 : i32
    return %c0_i32, %c0_i32_0 : i32, i32
  }
  func.func @transform_5(%arg0: i32) -> (i32, i32) {
    %c0_i32 = arith.constant 0 : i32
    %c0_i32_0 = arith.constant 0 : i32
    %c0_i32_1 = arith.constant 0 : i32
    return %c0_i32, %c0_i32_0 : i32, i32
  }
  func.func @transform_6(%arg0: i32) -> (i32, i32) {
    %c0_i32 = arith.constant 0 : i32
    %c0_i32_0 = arith.constant 0 : i32
    %c0_i32_1 = arith.constant 0 : i32
    return %c0_i32, %c0_i32_0 : i32, i32
  }
  func.func @transform_7(%arg0: i32) -> (i32, i32) {
    %c0_i32 = arith.constant 0 : i32
    %c0_i32_0 = arith.constant 0 : i32
    %c0_i32_1 = arith.constant 0 : i32
    return %c0_i32, %c0_i32_0 : i32, i32
  }
  func.func @transform_8(%arg0: i32) -> (i32, i32) {
    %c0_i32 = arith.constant 0 : i32
    %c0_i32_0 = arith.constant 0 : i32
    return %arg0, %c0_i32 : i32, i32
  }
}

</mosaic_0001>

<bundles_post_ra>
// kernel: squeeze.1
= control target key start
LH: loop header
LB: loop body
LE: loop exit
PB: predicated region body
PF: predicated region fallthrough
CT: control target
= control target key end

     0   :  { %s85_s0 = inlined_call_operand.vmem [shape: f32[32], index: 0, kind: input, shape index: {}]   ;;  %s86_s1 = inlined_call_operand.hbm [shape: f32[2,16], index: 1, kind: output, shape index: {}]  }
   0x1   :  { %v5_v0 = vld [vmem:[%s85_s0] sm:$0x1] }
   0x2   :  { %2 = vsyncpa [#allocation1], 0  ;;  %6 = vst [vmem:[#allocation3] sm:$0x1] %v5_v0  ;;  %vm8_vm0 = vcmask 130048   ;;  %s58_s0 = smov 112  }
   0x3   :  { %s59_s8 = smov [#allocation0]  }
   0x4   :  { %s26_s9 = sshll.u32 %s59_s8, 4  ;;  %s27_s9 = int_to_ptr.vmem [resolvable:$true] %s26_s9 }
   0x5   :  { %s34_s10 = scalar_lea.vmem %s27_s9, 32  ;;  %p39_p1 = scmp.lt.s32.totalorder %s27_s9, %s27_s9 }
   0x6   :  { %p35_p0 = scmp.ne.s32.totalorder %s27_s9, %s34_s10  ;;  %p40_p2 = scmp.lt.s32.totalorder %s34_s10, %s34_s10 }
   0x8   :  { %p41_p3 = por %p40_p2, %p39_p1 }
   0x9   :  { %v10_v1 = vld [vmem:[#allocation3] sm:$0x1]  }
   0xa   :  { %v7_v2 = vld [vmem:[#allocation3] sm:$0x1]   ;;  %11 = vrot.lane.b32.xlu0 %v10_v1, %s58_s0  ;;  %p42_p4 = pnand %p41_p3, %p35_p0 }
   0xb   :  { %9 = vst.msk [vmem:[#allocation2] sm:$0x1] %vm8_vm0, %v7_v2  }
  0x7c   :  { %v12_v3 = vpop.permute.xlu0 %11  }
  0x7d   :  { %15 = vst.msk [vmem:[#allocation2 + $0x1] sm:$0x1] %vm8_vm0, %v12_v3  }
  0x84   :  { %v19_v4 = vld [vmem:[#allocation2] sm:$0x3] }
  0x85   :  { %21 = vst [vmem:[#allocation0] sm:$0x3] %v19_v4 }
  0x86   :  { %45 = shalt.err (!%p42_p4)
}
  0x87   :  { %s46_s13 = scalar_lea.hbm %s86_s1, 32 }
  0x88   :  { %p47_p5 = scmp.ne.s32.totalorder %s86_s1, %s46_s13  ;;  %p50_p6 = scmp.lt.u32.totalorder %s46_s13, %s86_s1 }
  0x8a   :  { %p52_p7 = pnand %p50_p6, %p47_p5 }
  0x8c   :  { %55 = shalt.err (!%p52_p7)
}
  0x8d   :  { %29 = dma.vmem_to_hbm [thread:$0]  %s27_s9, 32, %s86_s1, [#allocation1]  }
  0x8e   :  { %56 = dma.done.wait [#allocation1], 32  }
  0x8f   :  { %57 = vsyncadd [#allocation1], 4294967264 }
  0x90   :  { %31 = vsyncpa [#allocation1], 1 }

// kernel: mae_autobin_forward.3
= control target key start
LH: loop header
LB: loop body
LE: loop exit
PB: predicated region body
PF: predicated region fallthrough
CT: control target
= control target key end

     0   :  { %v383_v0 = vmov 0   ;;  %vm88_vm0 = vcmask 1041408   ;;  %vm384_vm1 = vmmov 1   ;;  %vm81_vm4 = vcmask 80896   ;;  %s516_s0 = inlined_call_operand.vmem [shape: f32[16,1], index: 0, kind: input, shape index: {}]   ;;  %s517_s4 = inlined_call_operand.vmem [shape: f32[10,10], index: 4, kind: input, shape index: {}]   ;;  %s518_s2 = inlined_call_operand.vmem [shape: f32[1,10], index: 2, kind: input, shape index: {}]   ;;  %s519_s3 = inlined_call_operand.vmem [shape: f32[1,10], index: 3, kind: input, shape index: {}]   ;;  %s520_s5 = inlined_call_operand.vmem [shape: f32[1,10], index: 5, kind: input, shape index: {}]   ;;  %s521_s6 = inlined_call_operand.vmem [shape: f32[10,32], index: 6, kind: input, shape index: {}]   ;;  %s522_s7 = inlined_call_operand.vmem [shape: f32[1,32], index: 7, kind: input, shape index: {}]   ;;  %s523_s8 = inlined_call_operand.vmem [shape: f32[1,32], index: 8, kind: input, shape index: {}]   ;;  %s524_s1 = inlined_call_operand.vmem [shape: f32[16,32], index: 1, kind: input, shape index: {}]   ;;  %s525_s9 = inlined_call_operand.vmem [shape: f32[16,32], index: 9, kind: output, shape index: {}]  }
   0x1   :  { %373 = vset.pattern.permute.xlu0 %v383_v0  ;;  %v439_v1 = vld [vmem:[%s516_s0] sm:$0xff]  ;;  %374 = vset.pattern.permute.xlu1 %v383_v0  ;;  %v446_v2 = vld [vmem:[%s516_s0 + $0x8] sm:$0xff]  ;;  %vm455_vm2 = vmpackc.low %vm88_vm0, %vm384_vm1  ;;  %vm319_vm14 = vcmask 261120  }
   0x2   :  { %45 = vperm.xlu0 %373, %v439_v1   ;;  %v36_v3 = vld [vmem:[%s517_s4] sm:$0xff]  ;;  %v37_v4 = vld [vmem:[%s517_s4 + $0x8] sm:$0x3]  ;;  %vm275_vm6 = vcmp.eq.f32.partialorder %v439_v1, 102.0  ;;  %vm276_vm7 = vcmp.eq.f32.partialorder %v446_v2, 102.0  ;;  %vm295_vm8 = vcmp.eq.f32.partialorder %v439_v1, 103.0 }
   0x3   :  { %v359_v5 = vpack.c.bf16 %v37_v4, %v36_v3  ;;  %v326_v7 = vld [vmem:[%s518_s2] ss:$0 sm:$0xff]  ;;  %v40_v39 = vld [vmem:[%s521_s6 + $0x8] sm:$0x3]  ;;  %v277_v41 = vsel %vm275_vm6, 1, %v383_v0  ;;  %v278_v42 = vsel %vm276_vm7, 1, %v383_v0 }
   0x4   :  { %v327_v8 = vld [vmem:[%s519_s3] ss:$0 sm:$0xff]  ;;  %v297_v43 = vsel %vm295_vm8, 1, %v383_v0  ;;  %vm296_vm9 = vcmp.eq.f32.partialorder %v446_v2, 103.0  ;;  %v316_v58 = vld [vmem:[%s524_s1 + $0x8] sm:$0xff] }
   0x5   :  { %361 = vmatprep.subr.msk.bf16.mxu0 %vm455_vm2, %v359_v5  ;;  %v328_v19 = vld [vmem:[%s520_s5] ss:$0 sm:$0xff]  ;;  %v298_v44 = vsel %vm296_vm9, 1, %v383_v0 }
   0x6   :  { %50 = vperm.xlu0 %373, %v446_v2   ;;  %364 = vmatpush3.bf16.msk.msra.mxu0 %vm455_vm2, %v359_v5  ;;  %v39_v38 = vld [vmem:[%s521_s6] sm:$0xff] }
   0x7   :  { %v365_v40 = vpack.c.bf16 %v40_v39, %v39_v38  ;;  %v335_v55 = vld [vmem:[%s522_s7] ss:$0 sm:$0xff] }
   0x8   :  { %v336_v56 = vld [vmem:[%s523_s8] ss:$0 sm:$0xff] }
   0x9   :  { %367 = vmatprep.subr.msk.bf16.mxu1 %vm455_vm2, %v365_v40  ;;  %v315_v61 = vld [vmem:[%s524_s1] sm:$0xff] }
   0xa   :  { %370 = vmatpush3.bf16.msk.msra.mxu1 %vm455_vm2, %v365_v40 }
  0x81   :  { %v46_v9 = vpop.permute.xlu0 %45 }
  0x82   :  { %v59_v10 = vmul.f32 %v326_v7, %v46_v9 }
  0x84   :  { %v67_v11 = vadd.f32 %v327_v8, %v59_v10 }
  0x85   :  { %v51_v12 = vpop.permute.xlu0 %50 }
  0x86   :  { %v60_v13 = vmul.f32 %v326_v7, %v51_v12  ;;  %vm69_vm3 = vcmp.ge.f32.partialorder %v67_v11, 0.0  ;;  %v71_v14 = vmul.f32 0.1, %v67_v11 }
  0x88   :  { %v68_v15 = vadd.f32 %v327_v8, %v60_v13  ;;  %v73_v16 = vsel %vm69_vm3, %v67_v11, %v71_v14 }
  0x89   :  { %349 = vmatprep.mubr.msk.f32.mxu0 %vm81_vm4, %v73_v16 }
  0x8a   :  { %v72_v17 = vmul.f32 0.1, %v68_v15  ;;  %vm70_vm5 = vcmp.ge.f32.partialorder %v68_v15, 0.0 }
  0x8c   :  { %v74_v18 = vsel %vm70_vm5, %v68_v15, %v72_v17 }
  0x8d   :  { %350 = vmatmul.mubr.msk.f32.vlgmr.msra.gmra.mrb[0].mxu0 %vm81_vm4, %v74_v18 }
 0x160   :  { %v351_v20 = vpop.f32.mrb[0].mxu0 }
 0x161   :  { %v158_v21 = vpop.f32.mrb[1].mxu0  ;;  %v164_v22 = vadd.f32 %v351_v20, %v328_v19 }
 0x162   :  { %v159_v23 = vadd.f32 %v328_v19, %v158_v21 }
 0x163   :  { %v168_v26 = vadd.f32 %v164_v22, %v74_v18 }
 0x164   :  { %v167_v24 = vadd.f32 %v159_v23, %v73_v16 }
 0x165   :  { %v172_v27 = vsel %vm81_vm4, %v168_v26, -inf }
 0x166   :  { %v169_v25 = vsel %vm81_vm4, %v167_v24, -inf }
 0x167   :  { %170 = vmax.xlane.f32.xlu1 %v169_v25 }
 0x16b   :  { %173 = vmax.xlane.f32.xlu1 %v172_v27 }
 0x1f4   :  { %v171_v28 = vpop.xlane.xlu1 %170 }
 0x1f5   :  { %v175_v29 = vsub.f32 %v167_v24, %v171_v28 }
 0x1f7   :  { %v177_v30 = vmul.f32 1.442695, %v175_v29 }
 0x1f8   :  { %v174_v31 = vpop.xlane.xlu1 %173 }
 0x1f9   :  { %375 = vpow2.f32 %v177_v30  ;;  %v176_v32 = vsub.f32 %v168_v26, %v174_v31 }
 0x1fb   :  { %v179_v33 = vmul.f32 1.442695, %v176_v32 }
 0x1fd   :  { %377 = vpow2.f32 %v179_v33 }
 0x203   :  { %v376_v34 = vpop.eup %375 }
 0x204   :  { %v181_v35 = vsel %vm81_vm4, %v376_v34, 0.0 }
 0x205   :  { %182 = vadd.xlane.f32.xlu0 %v181_v35 }
 0x207   :  { %v378_v36 = vpop.eup %377 }
 0x208   :  { %v184_v37 = vsel %vm81_vm4, %v378_v36, 0.0 }
 0x209   :  { %185 = vadd.xlane.f32.xlu1 %v184_v37 }
 0x21a   :  { %280 = vperm.xlu1 %374, %v277_v41  }
 0x21e   :  { %283 = vperm.xlu1 %374, %v278_v42  }
 0x222   :  { %300 = vperm.xlu1 %374, %v297_v43  }
 0x226   :  { %303 = vperm.xlu1 %374, %v298_v44  }
 0x292   :  { %v183_v45 = vpop.xlane.xlu0 %182 }
 0x293   :  { %379 = vrcp.f32 %v183_v45 }
 0x296   :  { %v186_v46 = vpop.xlane.xlu1 %185 }
 0x297   :  { %381 = vrcp.f32 %v186_v46 }
 0x29a   :  { %v281_v51 = vpop.permute.xlu1 %280 }
 0x29b   :  { %vm285_vm11 = vcmp.eq.s32.totalorder %v281_v51, 1 }
 0x29d   :  { %v380_v47 = vpop.eup %379 }
 0x29e   :  { %v189_v48 = vmul.f32 %v380_v47, %v376_v34  ;;  %v284_v52 = vpop.permute.xlu1 %283 }
 0x29f   :  { %vm286_vm10 = vcmp.eq.s32.totalorder %v284_v52, 1 }
 0x2a0   :  { %356 = vmatprep.mubr.msk.f32.mxu1 %vm81_vm4, %v189_v48 }
 0x2a1   :  { %v382_v49 = vpop.eup %381 }
 0x2a2   :  { %v190_v50 = vmul.f32 %v382_v49, %v378_v36  ;;  %v301_v53 = vpop.permute.xlu1 %300 }
 0x2a3   :  { %vm305_vm13 = vcmp.eq.s32.totalorder %v301_v53, 1 }
 0x2a4   :  { %357 = vmatmul.mubr.msk.f32.vlgmr.msra.gmra.mrb[0].mxu1 %vm81_vm4, %v190_v50 }
 0x2a6   :  { %v304_v54 = vpop.permute.xlu1 %303 }
 0x2a7   :  { %vm306_vm12 = vcmp.eq.s32.totalorder %v304_v54, 1 }
 0x377   :  { %v358_v57 = vpop.f32.mrb[0].mxu1 }
 0x378   :  { %v294_v59 = vsel %vm286_vm10, %v335_v55, %v358_v57  ;;  %v266_v60 = vpop.f32.mrb[1].mxu1 }
 0x379   :  { %v314_v62 = vsel %vm306_vm12, %v336_v56, %v294_v59  ;;  %v293_v63 = vsel %vm285_vm11, %v335_v55, %v266_v60 }
 0x37a   :  { %v318_v0 = vadd.f32 %v316_v58, %v314_v62  ;;  %v313_v1 = vsel %vm305_vm13, %v336_v56, %v293_v63 }
 0x37b   :  { %v317_v2 = vadd.f32 %v315_v61, %v313_v1 }
 0x37c   :  { %321 = vst.msk [vmem:[%s525_s9 + $0x8] sm:$0xff] %vm319_vm14, %v318_v0 }
 0x37d   :  { %320 = vst.msk [vmem:[%s525_s9] sm:$0xff] %vm319_vm14, %v317_v2 }

// kernel: mae_autobin_forward.4
= control target key start
LH: loop header
LB: loop body
LE: loop exit
PB: predicated region body
PF: predicated region fallthrough
CT: control target
= control target key end

     0   :  { %v506_v0 = vmov 0   ;;  %vm113_vm0 = vcmask 1041408   ;;  %vm507_vm1 = vmmov 1   ;;  %vm100_vm4 = vcmask 80896   ;;  %s666_s0 = inlined_call_operand.vmem [shape: f32[32,1], index: 0, kind: input, shape index: {}]   ;;  %s667_s3 = inlined_call_operand.vmem [shape: f32[10,10], index: 3, kind: input, shape index: {}]   ;;  %s668_s1 = inlined_call_operand.vmem [shape: f32[1,10], index: 1, kind: input, shape index: {}]   ;;  %s669_s2 = inlined_call_operand.vmem [shape: f32[1,10], index: 2, kind: input, shape index: {}]   ;;  %s670_s4 = inlined_call_operand.vmem [shape: f32[1,10], index: 4, kind: input, shape index: {}]   ;;  %s671_s5 = inlined_call_operand.vmem [shape: f32[10,32], index: 5, kind: input, shape index: {}]   ;;  %s672_s6 = inlined_call_operand.vmem [shape: f32[1,32], index: 6, kind: input, shape index: {}]   ;;  %s673_s7 = inlined_call_operand.vmem [shape: f32[1,32], index: 7, kind: input, shape index: {}]   ;;  %s674_s8 = inlined_call_operand.vmem [shape: f32[32,32], index: 8, kind: output, shape index: {}]  }
   0x1   :  { %489 = vset.pattern.permute.xlu1 %v506_v0  ;;  %488 = vset.pattern.permute.xlu0 %v506_v0  ;;  %v558_v1 = vld [vmem:[%s666_s0 + $0x10] sm:$0xff]  ;;  %v563_v2 = vld [vmem:[%s666_s0] sm:$0xff]  ;;  %v570_v3 = vld [vmem:[%s666_s0 + $0x18] sm:$0xff] }
   0x2   :  { %54 = vperm.xlu1 %489, %v558_v1   ;;  %44 = vperm.xlu0 %488, %v563_v2   ;;  %v575_v4 = vld [vmem:[%s666_s0 + $0x8] sm:$0xff]  ;;  %v35_v5 = vld [vmem:[%s667_s3] sm:$0xff]  ;;  %vm585_vm2 = vmpackc.low %vm113_vm0, %vm507_vm1  ;;  %vm350_vm8 = vcmp.eq.f32.partialorder %v563_v2, 102.0  ;;  %vm352_vm9 = vcmp.eq.f32.partialorder %v558_v1, 102.0  ;;  %vm353_vm10 = vcmp.eq.f32.partialorder %v570_v3, 102.0  ;;  %vm384_vm13 = vcmp.eq.f32.partialorder %v563_v2, 103.0 }
   0x3   :  { %v36_v6 = vld [vmem:[%s667_s3 + $0x8] sm:$0x3]  ;;  %v427_v9 = vld [vmem:[%s668_s1] ss:$0 sm:$0xff]  ;;  %vm351_vm11 = vcmp.eq.f32.partialorder %v575_v4, 102.0  ;;  %vm385_vm12 = vcmp.eq.f32.partialorder %v575_v4, 103.0 }
   0x4   :  { %v474_v7 = vpack.c.bf16 %v36_v6, %v35_v5  ;;  %v428_v10 = vld [vmem:[%s669_s2] ss:$0 sm:$0xff]  ;;  %vm387_vm14 = vcmp.eq.f32.partialorder %v570_v3, 103.0  ;;  %vm386_vm15 = vcmp.eq.f32.partialorder %v558_v1, 103.0  ;;  %vm418_vm1 = vcmask 261120  }
   0x5   :  { %v429_v31 = vld [vmem:[%s670_s4] ss:$0 sm:$0xff]  ;;  %v391_v8 = vsel %vm387_vm14, 1, %v506_v0 }
   0x6   :  { %59 = vperm.xlu1 %489, %v570_v3   ;;  %49 = vperm.xlu0 %488, %v575_v4  }
   0x7   :  { %476 = vmatprep.subr.msk.bf16.mxu0 %vm585_vm2, %v474_v7 }
   0x8   :  { %479 = vmatpush3.bf16.msk.msra.mxu0 %vm585_vm2, %v474_v7 }
  0x81   :  { %v55_v11 = vpop.permute.xlu1 %54  ;;  %v45_v12 = vpop.permute.xlu0 %44 }
  0x82   :  { %v70_v13 = vmul.f32 %v427_v9, %v55_v11  ;;  %v68_v14 = vmul.f32 %v427_v9, %v45_v12  ;;  %v356_v11 = vsel %vm352_vm9, 1, %v506_v0  ;;  %v38_v12 = vld [vmem:[%s671_s5] sm:$0xff] }
  0x84   :  { %v78_v15 = vadd.f32 %v428_v10, %v68_v14  ;;  %v80_v16 = vadd.f32 %v428_v10, %v70_v13  ;;  %v39_v13 = vld [vmem:[%s671_s5 + $0x8] sm:$0x3] }
  0x85   :  { %v60_v17 = vpop.permute.xlu1 %59  ;;  %v50_v18 = vpop.permute.xlu0 %49  ;;  %v480_v14 = vpack.c.bf16 %v39_v13, %v38_v12 }
  0x86   :  { %v71_v19 = vmul.f32 %v427_v9, %v60_v17  ;;  %v69_v20 = vmul.f32 %v427_v9, %v50_v18  ;;  %vm82_vm3 = vcmp.ge.f32.partialorder %v78_v15, 0.0  ;;  %v86_v21 = vmul.f32 0.1, %v78_v15 }
  0x87   :  { %v88_v24 = vmul.f32 0.1, %v80_v16  ;;  %vm84_vm6 = vcmp.ge.f32.partialorder %v80_v16, 0.0  ;;  %482 = vmatprep.subr.msk.bf16.mxu1 %vm585_vm2, %v480_v14  ;;  %v389_v17 = vsel %vm385_vm12, 1, %v506_v0  ;;  %v388_v18 = vsel %vm384_vm13, 1, %v506_v0 }
  0x88   :  { %v81_v22 = vadd.f32 %v428_v10, %v71_v19  ;;  %v79_v23 = vadd.f32 %v428_v10, %v69_v20  ;;  %v90_v25 = vsel %vm82_vm3, %v78_v15, %v86_v21  ;;  %v354_v10 = vsel %vm350_vm8, 1, %v506_v0  ;;  %485 = vmatpush3.bf16.msk.msra.mxu1 %vm585_vm2, %v480_v14 }
  0x89   :  { %458 = vmatprep.mubr.msk.f32.mxu0 %vm100_vm4, %v90_v25  ;;  %v92_v29 = vsel %vm84_vm6, %v80_v16, %v88_v24  ;;  %v357_v15 = vsel %vm353_vm10, 1, %v506_v0  ;;  %v355_v16 = vsel %vm351_vm11, 1, %v506_v0  ;;  %v390_v19 = vsel %vm386_vm15, 1, %v506_v0 }
  0x8a   :  { %v87_v26 = vmul.f32 0.1, %v79_v23  ;;  %vm83_vm5 = vcmp.ge.f32.partialorder %v79_v23, 0.0  ;;  %v89_v27 = vmul.f32 0.1, %v81_v22  ;;  %vm85_vm7 = vcmp.ge.f32.partialorder %v81_v22, 0.0 }
  0x8c   :  { %v91_v28 = vsel %vm83_vm5, %v79_v23, %v87_v26  ;;  %v93_v30 = vsel %vm85_vm7, %v81_v22, %v89_v27 }
  0x8d   :  { %459 = vmatmul.mubr.msk.f32.vlgmr.msra.gmra.mrb[0].mxu0 %vm100_vm4, %v91_v28 }
  0x8e   :  { %461 = vmatprep.mubr.msk.f32.mxu0 %vm100_vm4, %v92_v29 }
  0x91   :  { %462 = vmatmul.mubr.msk.f32.gmra.mrb[2].mxu0 %vm100_vm4, %v93_v30 }
 0x160   :  { %v460_v32 = vpop.f32.mrb[0].mxu0 }
 0x161   :  { %v189_v33 = vadd.f32 %v460_v32, %v429_v31  ;;  %v183_v34 = vpop.f32.mrb[1].mxu0  ;;  %v440_v32 = vld [vmem:[%s672_s6] ss:$0 sm:$0xff] }
 0x162   :  { %v184_v35 = vadd.f32 %v429_v31, %v183_v34  ;;  %v441_v34 = vld [vmem:[%s673_s7] ss:$0 sm:$0xff] }
 0x163   :  { %v203_v36 = vadd.f32 %v189_v33, %v91_v28 }
 0x164   :  { %v463_v37 = vpop.f32.mrb[2].mxu0  ;;  %v202_v38 = vadd.f32 %v184_v35, %v90_v25 }
 0x165   :  { %v193_v39 = vpop.f32.mrb[3].mxu0  ;;  %v209_v40 = vsel %vm100_vm4, %v203_v36, -inf  ;;  %v199_v41 = vadd.f32 %v463_v37, %v429_v31 }
 0x166   :  { %v194_v42 = vadd.f32 %v429_v31, %v193_v39  ;;  %210 = vmax.xlane.f32.xlu1 %v209_v40  ;;  %v206_v43 = vsel %vm100_vm4, %v202_v38, -inf }
 0x167   :  { %207 = vmax.xlane.f32.xlu0 %v206_v43  ;;  %v205_v46 = vadd.f32 %v199_v41, %v93_v30 }
 0x168   :  { %v204_v44 = vadd.f32 %v194_v42, %v92_v29 }
 0x169   :  { %v215_v47 = vsel %vm100_vm4, %v205_v46, -inf }
 0x16a   :  { %v212_v45 = vsel %vm100_vm4, %v204_v44, -inf }
 0x16b   :  { %213 = vmax.xlane.f32.xlu0 %v212_v45 }
 0x16f   :  { %216 = vmax.xlane.f32.xlu0 %v215_v47 }
 0x1f3   :  { %v211_v48 = vpop.xlane.xlu1 %210 }
 0x1f4   :  { %v219_v49 = vsub.f32 %v203_v36, %v211_v48  ;;  %v208_v50 = vpop.xlane.xlu0 %207 }
 0x1f5   :  { %v218_v51 = vsub.f32 %v202_v38, %v208_v50 }
 0x1f6   :  { %v224_v52 = vmul.f32 1.442695, %v219_v49 }
 0x1f7   :  { %v222_v53 = vmul.f32 1.442695, %v218_v51 }
 0x1f8   :  { %490 = vpow2.f32 %v224_v52  ;;  %v214_v54 = vpop.xlane.xlu0 %213 }
 0x1f9   :  { %492 = vpow2.f32 %v222_v53  ;;  %v220_v55 = vsub.f32 %v204_v44, %v214_v54 }
 0x1fb   :  { %v226_v56 = vmul.f32 1.442695, %v220_v55 }
 0x1fc   :  { %v217_v57 = vpop.xlane.xlu0 %216 }
 0x1fd   :  { %494 = vpow2.f32 %v226_v56  ;;  %v221_v58 = vsub.f32 %v205_v46, %v217_v57 }
 0x1ff   :  { %v228_v59 = vmul.f32 1.442695, %v221_v58 }
 0x201   :  { %496 = vpow2.f32 %v228_v59 }
 0x202   :  { %v491_v60 = vpop.eup %490 }
 0x203   :  { %v493_v61 = vpop.eup %492  ;;  %v233_v62 = vsel %vm100_vm4, %v491_v60, 0.0 }
 0x204   :  { %234 = vadd.xlane.f32.xlu0 %v233_v62  ;;  %v230_v63 = vsel %vm100_vm4, %v493_v61, 0.0 }
 0x205   :  { %231 = vadd.xlane.f32.xlu1 %v230_v63 }
 0x207   :  { %v495_v5 = vpop.eup %494 }
 0x208   :  { %v236_v6 = vsel %vm100_vm4, %v495_v5, 0.0 }
 0x209   :  { %237 = vadd.xlane.f32.xlu1 %v236_v6 }
 0x20b   :  { %v497_v7 = vpop.eup %496 }
 0x20c   :  { %v239_v9 = vsel %vm100_vm4, %v497_v7, 0.0 }
 0x20d   :  { %240 = vadd.xlane.f32.xlu0 %v239_v9 }
 0x21a   :  { %359 = vperm.xlu1 %489, %v354_v10  }
 0x21e   :  { %365 = vperm.xlu1 %489, %v356_v11  }
 0x222   :  { %368 = vperm.xlu1 %489, %v357_v15  }
 0x223   :  { %362 = vperm.xlu0 %488, %v355_v16  }
 0x226   :  { %396 = vperm.xlu1 %489, %v389_v17  }
 0x227   :  { %393 = vperm.xlu0 %488, %v388_v18  }
 0x22a   :  { %402 = vperm.xlu1 %489, %v391_v8  }
 0x22b   :  { %399 = vperm.xlu0 %488, %v390_v19  }
 0x291   :  { %v235_v4 = vpop.xlane.xlu0 %234 }
 0x292   :  { %498 = vrcp.f32 %v235_v4  ;;  %v232_v2 = vpop.xlane.xlu1 %231 }
 0x293   :  { %500 = vrcp.f32 %v232_v2 }
 0x296   :  { %v238_v20 = vpop.xlane.xlu1 %237 }
 0x297   :  { %502 = vrcp.f32 %v238_v20 }
 0x29a   :  { %v241_v21 = vpop.xlane.xlu0 %240  ;;  %v360_v27 = vpop.permute.xlu1 %359 }
 0x29b   :  { %504 = vrcp.f32 %v241_v21  ;;  %vm370_vm2 = vcmp.eq.s32.totalorder %v360_v27, 1 }
 0x29c   :  { %v499_v22 = vpop.eup %498 }
 0x29d   :  { %v501_v3 = vpop.eup %500  ;;  %v247_v1 = vmul.f32 %v499_v22, %v491_v60 }
 0x29e   :  { %v246_v23 = vmul.f32 %v501_v3, %v493_v61  ;;  %v366_v28 = vpop.permute.xlu1 %365 }
 0x29f   :  { %vm372_vm6 = vcmp.eq.s32.totalorder %v366_v28, 1 }
 0x2a0   :  { %468 = vmatprep.mubr.msk.f32.mxu1 %vm100_vm4, %v246_v23 }
 0x2a1   :  { %v503_v24 = vpop.eup %502  ;;  %469 = vmatmul.mubr.msk.f32.vlgmr.msra.gmra.mrb[0].mxu1 %vm100_vm4, %v247_v1 }
 0x2a2   :  { %v248_v0 = vmul.f32 %v503_v24, %v495_v5  ;;  %v369_v29 = vpop.permute.xlu1 %368  ;;  %v363_v30 = vpop.permute.xlu0 %362 }
 0x2a3   :  { %vm371_vm0 = vcmp.eq.s32.totalorder %v363_v30, 1  ;;  %vm373_vm5 = vcmp.eq.s32.totalorder %v369_v29, 1 }
 0x2a4   :  { %471 = vmatprep.mubr.msk.f32.mxu1 %vm100_vm4, %v248_v0 }
 0x2a5   :  { %v505_v25 = vpop.eup %504 }
 0x2a6   :  { %v249_v26 = vmul.f32 %v505_v25, %v497_v7  ;;  %v397_v31 = vpop.permute.xlu1 %396  ;;  %v394_v33 = vpop.permute.xlu0 %393 }
 0x2a7   :  { %vm405_vm3 = vcmp.eq.s32.totalorder %v397_v31, 1 }
 0x2a8   :  { %472 = vmatmul.mubr.msk.f32.gmra.mrb[2].mxu1 %vm100_vm4, %v249_v26  ;;  %vm404_vm4 = vcmp.eq.s32.totalorder %v394_v33, 1 }
 0x2aa   :  { %v403_v41 = vpop.permute.xlu1 %402  ;;  %v400_v42 = vpop.permute.xlu0 %399 }
 0x2ab   :  { %vm407_vm7 = vcmp.eq.s32.totalorder %v403_v41, 1  ;;  %vm406_vm8 = vcmp.eq.s32.totalorder %v400_v42, 1 }
 0x374   :  { %v470_v35 = vpop.f32.mrb[0].mxu1 }
 0x375   :  { %v381_v36 = vsel %vm371_vm0, %v440_v32, %v470_v35  ;;  %v331_v37 = vpop.f32.mrb[1].mxu1 }
 0x376   :  { %v415_v38 = vsel %vm405_vm3, %v441_v34, %v381_v36  ;;  %v380_v39 = vsel %vm370_vm2, %v440_v32, %v331_v37 }
 0x377   :  { %420 = vst.msk [vmem:[%s674_s8 + $0x8] sm:$0xff] %vm418_vm1, %v415_v38  ;;  %v414_v40 = vsel %vm404_vm4, %v441_v34, %v380_v39 }
 0x378   :  { %419 = vst.msk [vmem:[%s674_s8] sm:$0xff] %vm418_vm1, %v414_v40 }
 0x37b   :  { %v473_v43 = vpop.f32.mrb[2].mxu1 }
 0x37c   :  { %v383_v44 = vsel %vm373_vm5, %v440_v32, %v473_v43  ;;  %v341_v45 = vpop.f32.mrb[3].mxu1 }
 0x37d   :  { %v417_v46 = vsel %vm407_vm7, %v441_v34, %v383_v44  ;;  %v382_v47 = vsel %vm372_vm6, %v440_v32, %v341_v45 }
 0x37e   :  { %422 = vst.msk [vmem:[%s674_s8 + $0x18] sm:$0xff] %vm418_vm1, %v417_v46  ;;  %v416_v48 = vsel %vm406_vm8, %v441_v34, %v382_v47 }
 0x37f   :  { %421 = vst.msk [vmem:[%s674_s8 + $0x10] sm:$0xff] %vm418_vm1, %v416_v48 }

// kernel: mae_autobin_forward.5
= control target key start
LH: loop header
LB: loop body
LE: loop exit
PB: predicated region body
PF: predicated region fallthrough
CT: control target
= control target key end

     0   :  { %vm54_vm0 = vcmask 261120   ;;  %vm273_vm1 = vcmask 7168   ;;  %s481_s2 = inlined_call_operand.vmem [shape: f32[32,32], index: 2, kind: input, shape index: {}]   ;;  %s482_s0 = inlined_call_operand.vmem [shape: f32[32,32], index: 0, kind: input, shape index: {}]   ;;  %s483_s1 = inlined_call_operand.vmem [shape: f32[32,32], index: 1, kind: input, shape index: {}]   ;;  %s484_s3 = inlined_call_operand.vmem [shape: f32[1,32], index: 3, kind: input, shape index: {}]   ;;  %s485_s7 = inlined_call_operand.<no memory space> [shape: f32[1,1], index: 7, kind: input, shape index: {}]   ;;  %s486_s4 = inlined_call_operand.vmem [shape: f32[1,32], index: 4, kind: input, shape index: {}]   ;;  %s487_s5 = inlined_call_operand.vmem [shape: f32[1,32], index: 5, kind: input, shape index: {}]   ;;  %s488_s6 = inlined_call_operand.vmem [shape: f32[1,32], index: 6, kind: input, shape index: {}]   ;;  %s489_s8 = inlined_call_operand.vmem [shape: f32[32,1], index: 8, kind: output, shape index: {}]  }
   0x1   :  { %v43_v0 = vld [vmem:[%s481_s2] sm:$0xff]  ;;  %v44_v1 = vld [vmem:[%s481_s2 + $0x8] sm:$0xff]  ;;  %v45_v2 = vld [vmem:[%s481_s2 + $0x10] sm:$0xff]  ;;  %v13_v39 = vstv %s485_s7 }
   0x2   :  { %v313_v3 = vpack.c.bf16 %v44_v1, %v43_v0  ;;  %v46_v4 = vld [vmem:[%s481_s2 + $0x18] sm:$0xff]  ;;  %v31_v5 = vld [vmem:[%s482_s0] sm:$0xff]  ;;  %v33_v9 = vld [vmem:[%s482_s0 + $0x10] sm:$0xff]  ;;  %14 = vst [vmem:[#allocation2] sm:$0x1] %v13_v39 }
   0x3   :  { %v35_v6 = vld [vmem:[%s483_s1] sm:$0xff]  ;;  %v317_v7 = vpack.c.bf16 %v46_v4, %v45_v2  ;;  %v37_v10 = vld [vmem:[%s483_s1 + $0x10] sm:$0xff]  ;;  %v32_v12 = vld [vmem:[%s482_s0 + $0x8] sm:$0xff] }
   0x4   :  { %v39_v8 = vadd.f32 %v35_v6, %v31_v5  ;;  %314 = vmatprep.subr.bf16.mxu0 %v313_v3  ;;  %321 = vmatprep.subr.bf16.mxu1 %v313_v3  ;;  %v41_v11 = vadd.f32 %v37_v10, %v33_v9  ;;  %v36_v13 = vld [vmem:[%s483_s1 + $0x8] sm:$0xff]  ;;  %v34_v14 = vld [vmem:[%s482_s0 + $0x18] sm:$0xff]  ;;  %v282_v18 = vld [vmem:[%s484_s3] ss:$0 sm:$0xff] }
   0x5   :  { %316 = vmatpush3.bf16.msra.mxu0 %v313_v3  ;;  %323 = vmatpush3.bf16.msra.mxu1 %v313_v3  ;;  %v38_v15 = vld [vmem:[%s483_s1 + $0x18] sm:$0xff]  ;;  %v40_v16 = vadd.f32 %v36_v13, %v32_v12 }
   0x6   :  { %318 = vmatprep.subr.bf16.mxu0 %v317_v7  ;;  %322 = vmatprep.subr.bf16.mxu1 %v317_v7  ;;  %v42_v17 = vadd.f32 %v38_v15, %v34_v14  ;;  %v288_v14 = vld [vmem:[%s487_s5] ss:$0 sm:$0xff] }
   0x7   :  { %307 = vmatprep.mubr.msk.f32.mxu0 %vm54_vm0, %v39_v8  ;;  %310 = vmatprep.mubr.msk.f32.mxu1 %vm54_vm0, %v41_v11  ;;  %v287_v11 = vld [vmem:[%s486_s4] ss:$0 sm:$0xff] }
   0x9   :  { %320 = vmatpush3.bf16.msra.mxu0 %v317_v7  ;;  %324 = vmatpush3.bf16.msra.mxu1 %v317_v7  ;;  %v290_v39 = vld [vmem:[#allocation2] ss:$0 sm:$0xff] }
   0xc   :  { %308 = vmatmul.mubr.msk.f32.vlgmr.msra.gmra.mrb[0].mxu0 %vm54_vm0, %v40_v16  ;;  %311 = vmatmul.mubr.msk.f32.vlgmr.msra.gmra.mrb[0].mxu1 %vm54_vm0, %v42_v17 }
  0xdf   :  { %v309_v19 = vpop.f32.mrb[0].mxu0  ;;  %v312_v20 = vpop.f32.mrb[0].mxu1 }
  0xe0   :  { %v421_v21 = vadd.f32 %v309_v19, %v282_v18  ;;  %v423_v22 = vadd.f32 %v312_v20, %v282_v18  ;;  %v133_v23 = vpop.f32.mrb[1].mxu0  ;;  %v143_v24 = vpop.f32.mrb[1].mxu1  ;;  %v289_v20 = vld [vmem:[%s488_s6] ss:$0 sm:$0xff] }
  0xe1   :  { %v425_v25 = vadd.f32 %v282_v18, %v133_v23  ;;  %v427_v26 = vadd.f32 %v282_v18, %v143_v24 }
  0xe2   :  { %v161_v27 = vsel %vm54_vm0, %v423_v22, 0.0  ;;  %v155_v28 = vsel %vm54_vm0, %v421_v21, 0.0  ;;  %v170_v31 = vmul.f32 %v421_v21, %v421_v21  ;;  %v172_v35 = vmul.f32 %v423_v22, %v423_v22 }
  0xe3   :  { %162 = vadd.xlane.f32.xlu1 %v161_v27  ;;  %156 = vadd.xlane.f32.xlu0 %v155_v28  ;;  %v158_v29 = vsel %vm54_vm0, %v427_v26, 0.0  ;;  %v152_v30 = vsel %vm54_vm0, %v425_v25, 0.0  ;;  %v169_v32 = vmul.f32 %v425_v25, %v425_v25  ;;  %v171_v36 = vmul.f32 %v427_v26, %v427_v26 }
  0xe4   :  { %v176_v33 = vsel %vm54_vm0, %v170_v31, 0.0  ;;  %v182_v37 = vsel %vm54_vm0, %v172_v35, 0.0 }
  0xe5   :  { %v173_v34 = vsel %vm54_vm0, %v169_v32, 0.0  ;;  %v179_v38 = vsel %vm54_vm0, %v171_v36, 0.0 }
  0xe7   :  { %159 = vadd.xlane.f32.xlu1 %v158_v29  ;;  %153 = vadd.xlane.f32.xlu0 %v152_v30 }
  0xeb   :  { %177 = vadd.xlane.f32.xlu1 %v176_v33  ;;  %174 = vadd.xlane.f32.xlu0 %v173_v34 }
  0xef   :  { %183 = vadd.xlane.f32.xlu1 %v182_v37  ;;  %180 = vadd.xlane.f32.xlu0 %v179_v38 }
 0x170   :  { %v163_v40 = vpop.xlane.xlu1 %162  ;;  %v157_v41 = vpop.xlane.xlu0 %156 }
 0x171   :  { %v166_v44 = vmul.f32 0.03125, %v157_v41  ;;  %v168_v46 = vmul.f32 0.03125, %v163_v40 }
 0x173   :  { %v190_v50 = vmul.f32 %v166_v44, %v166_v44  ;;  %v192_v56 = vmul.f32 %v168_v46, %v168_v46  ;;  %v202_v8 = vsub.f32 %v421_v21, %v166_v44  ;;  %v204_v16 = vsub.f32 %v423_v22, %v168_v46 }
 0x174   :  { %v160_v42 = vpop.xlane.xlu1 %159  ;;  %v154_v43 = vpop.xlane.xlu0 %153 }
 0x175   :  { %v165_v45 = vmul.f32 0.03125, %v154_v43  ;;  %v167_v47 = vmul.f32 0.03125, %v160_v42 }
 0x177   :  { %v189_v51 = vmul.f32 %v165_v45, %v165_v45  ;;  %v191_v57 = vmul.f32 %v167_v47, %v167_v47  ;;  %v201_v10 = vsub.f32 %v425_v25, %v165_v45  ;;  %v203_v19 = vsub.f32 %v427_v26, %v167_v47 }
 0x178   :  { %v178_v48 = vpop.xlane.xlu1 %177  ;;  %v175_v49 = vpop.xlane.xlu0 %174 }
 0x179   :  { %v186_v52 = vmul.f32 0.03125, %v178_v48  ;;  %v185_v53 = vmul.f32 0.03125, %v175_v49 }
 0x17b   :  { %v194_v54 = vsub.f32 %v186_v52, %v190_v50  ;;  %v193_v55 = vsub.f32 %v185_v53, %v189_v51 }
 0x17c   :  { %v184_v58 = vpop.xlane.xlu1 %183  ;;  %v181_v59 = vpop.xlane.xlu0 %180 }
 0x17d   :  { %v198_v60 = vmax.f32 %v194_v54, 0.0  ;;  %v197_v61 = vmax.f32 %v193_v55, 0.0  ;;  %v188_v62 = vmul.f32 0.03125, %v184_v58  ;;  %v187_v63 = vmul.f32 0.03125, %v181_v59 }
 0x17f   :  { %v206_v0 = vadd.f32 1e-05, %v198_v60  ;;  %v205_v1 = vadd.f32 1e-05, %v197_v61  ;;  %v196_v2 = vsub.f32 %v188_v62, %v192_v56  ;;  %v195_v3 = vsub.f32 %v187_v63, %v191_v57 }
 0x181   :  { %325 = vrsqrt.f32 %v206_v0  ;;  %v200_v4 = vmax.f32 %v196_v2, 0.0  ;;  %v199_v5 = vmax.f32 %v195_v3, 0.0 }
 0x182   :  { %327 = vrsqrt.f32 %v205_v1 }
 0x183   :  { %v208_v6 = vadd.f32 1e-05, %v200_v4  ;;  %v207_v7 = vadd.f32 1e-05, %v199_v5 }
 0x185   :  { %329 = vrsqrt.f32 %v208_v6 }
 0x186   :  { %331 = vrsqrt.f32 %v207_v7 }
 0x18b   :  { %v326_v9 = vpop.eup %325 }
 0x18c   :  { %v328_v12 = vpop.eup %327  ;;  %v214_v13 = vmul.f32 %v326_v9, %v202_v8 }
 0x18d   :  { %v213_v15 = vmul.f32 %v328_v12, %v201_v10 }
 0x18e   :  { %v225_v17 = vmul.f32 %v287_v11, %v214_v13 }
 0x18f   :  { %v330_v18 = vpop.eup %329  ;;  %v224_v21 = vmul.f32 %v287_v11, %v213_v15 }
 0x190   :  { %v332_v23 = vpop.eup %331  ;;  %v236_v24 = vadd.f32 %v288_v14, %v225_v17  ;;  %v216_v25 = vmul.f32 %v330_v18, %v204_v16 }
 0x191   :  { %v235_v27 = vadd.f32 %v288_v14, %v224_v21  ;;  %v215_v28 = vmul.f32 %v332_v23, %v203_v19 }
 0x192   :  { %v247_v29 = vmul.f32 %v289_v20, %v236_v24  ;;  %v227_v30 = vmul.f32 %v287_v11, %v216_v25 }
 0x193   :  { %v246_v31 = vmul.f32 %v289_v20, %v235_v27  ;;  %v226_v32 = vmul.f32 %v287_v11, %v215_v28 }
 0x194   :  { %v253_v22 = vsel %vm54_vm0, %v247_v29, 0.0  ;;  %v238_v33 = vadd.f32 %v288_v14, %v227_v30 }
 0x195   :  { %254 = vadd.xlane.f32.xlu1 %v253_v22  ;;  %v250_v26 = vsel %vm54_vm0, %v246_v31, 0.0  ;;  %v237_v34 = vadd.f32 %v288_v14, %v226_v32 }
 0x196   :  { %251 = vadd.xlane.f32.xlu0 %v250_v26  ;;  %v249_v35 = vmul.f32 %v289_v20, %v238_v33 }
 0x197   :  { %v248_v36 = vmul.f32 %v289_v20, %v237_v34 }
 0x198   :  { %v259_v37 = vsel %vm54_vm0, %v249_v35, 0.0 }
 0x199   :  { %260 = vadd.xlane.f32.xlu1 %v259_v37  ;;  %v256_v38 = vsel %vm54_vm0, %v248_v36, 0.0 }
 0x19a   :  { %257 = vadd.xlane.f32.xlu0 %v256_v38 }
 0x222   :  { %v255_v40 = vpop.xlane.xlu1 %254 }
 0x223   :  { %v270_v41 = vadd.f32 %v290_v39, %v255_v40  ;;  %v252_v42 = vpop.xlane.xlu0 %251 }
 0x224   :  { %v269_v43 = vadd.f32 %v290_v39, %v252_v42 }
 0x225   :  { %275 = vst.msk [vmem:[%s489_s8 + $0x8] sm:$0xff] %vm273_vm1, %v270_v41 }
 0x226   :  { %274 = vst.msk [vmem:[%s489_s8] sm:$0xff] %vm273_vm1, %v269_v43  ;;  %v261_v44 = vpop.xlane.xlu1 %260 }
 0x227   :  { %v272_v45 = vadd.f32 %v290_v39, %v261_v44  ;;  %v258_v46 = vpop.xlane.xlu0 %257 }
 0x228   :  { %v271_v47 = vadd.f32 %v290_v39, %v258_v46 }
 0x229   :  { %277 = vst.msk [vmem:[%s489_s8 + $0x18] sm:$0xff] %vm273_vm1, %v272_v45 }
 0x22a   :  { %276 = vst.msk [vmem:[%s489_s8 + $0x10] sm:$0xff] %vm273_vm1, %v271_v47 }

</bundles_post_ra>
